<compile_context>
chip_gen: v6e
topology: v6e:2x2x1
jax: 0.10.0
libtpu: 0.0.40
codegen_flags: <defaults>
</compile_context>

<pallas_src>
import jax
import jax.numpy as jnp
from jax.experimental import pallas as pl
from jax.experimental.pallas import tpu as pltpu


def _conv1x1_kernel(x_ref, w_ref, b_ref, o_ref):
    """One (batch, T-tile) block of Y = W @ X + b.

    x_ref: (1, D, Tt)  activations (compute dtype)
    w_ref: (O, D)      weights     (compute dtype)
    b_ref: (O, 1)      bias        (f32)
    o_ref: (1, O, Tt)  output      (store dtype)
    """
    acc = jnp.dot(w_ref[...], x_ref[0], preferred_element_type=jnp.float32)  # (O, Tt)
    o_ref[0] = (acc + b_ref[...]).astype(o_ref.dtype)


def _vmem_limit_bytes():
    # Re-derive per generation: v5e/v6e have 128 MiB physical VMEM, v7x only 64 MiB.
    # Take half of physical (capped at 64 MiB) so double-buffered tiles + compiler
    # scratch keep comfortable headroom on every chip.
    try:
        cap = pltpu.get_tpu_info().vmem_capacity_bytes
        return int(max(16 << 20, min(cap // 2, 64 << 20)))
    except Exception:  # pragma: no cover - conservative fallback off-TPU / old jax
        return 32 << 20


def _pick_t_tile(T, D, O, in_itemsize):
    # Largest lane-dense (multiple-of-128) tile that divides T and keeps the
    # double-buffered working set modest.  Full-extent blocks are exempt from the
    # (8,128) divisibility rule, so fall back to T for small / awkward sizes.
    for cand in (1024, 512, 256, 128):
        if T % cand == 0:
            working = 2 * cand * (D * in_itemsize + O * 4)  # in + out double buffers
            if working < (16 << 20):
                return cand
    return T


def conv1d_1x1(x, weight, bias, *, compute_dtype=jnp.bfloat16):
    """x: [N, D, T], weight: [O, D], bias: [O] -> [N, O, T].  No wrapper transposes."""
    N, D, T = x.shape
    O = weight.shape[0]
    out_dtype = x.dtype

    xc = x.astype(compute_dtype)
    wc = weight.astype(compute_dtype)
    b2 = bias.astype(jnp.float32).reshape(O, 1)

    in_itemsize = jnp.dtype(compute_dtype).itemsize
    t_tile = _pick_t_tile(T, D, O, in_itemsize)
    grid = (N, T // t_tile)

    flops = 2 * N * O * D * T
    bytes_accessed = int(
        N * D * T * in_itemsize            # activations
        + O * D * in_itemsize              # weights (DMA'd once; constant index map)
        + O * 4                            # bias
        + N * O * T * jnp.dtype(out_dtype).itemsize  # output
    )

    return pl.pallas_call(
        _conv1x1_kernel,
        out_shape=jax.ShapeDtypeStruct((N, O, T), out_dtype),
        grid_spec=pltpu.PrefetchScalarGridSpec(
            num_scalar_prefetch=0,
            grid=grid,
            in_specs=[
                pl.BlockSpec((1, D, t_tile), lambda n, t: (n, 0, t)),
                pl.BlockSpec((O, D), lambda n, t: (0, 0)),       # resident weights
                pl.BlockSpec((O, 1), lambda n, t: (0, 0)),       # resident bias
            ],
            out_specs=pl.BlockSpec((1, O, t_tile), lambda n, t: (n, 0, t)),
        ),
        compiler_params=pltpu.CompilerParams(
            dimension_semantics=("parallel", "parallel"),
            vmem_limit_bytes=_vmem_limit_bytes(),
        ),
        cost_estimate=pl.CostEstimate(
            flops=flops, transcendentals=0, bytes_accessed=bytes_accessed),
    )(xc, wc, b2)


def decoder_forward(inputs, weight, bias, *, H, W, patch_size, out_channel,
                    compute_dtype=jnp.bfloat16, use_pallas=None):
    """inputs: [N, D, patch_num] -> outputs: [N, out_channel, H, W]."""
    N, D, patch_num = inputs.shape
    P = patch_size
    h_scale, w_scale = H // P, W // P
    assert patch_num == h_scale * w_scale
    O = out_channel * P * P

    if use_pallas is None:
        # At tiny sizes the Pallas call is pure launch/DMA overhead; let XLA win there.
        use_pallas = (N * patch_num * O) >= (1 << 20)

    if use_pallas:
        y = conv1d_1x1(inputs, weight, bias, compute_dtype=compute_dtype)
    else:
        y = (jnp.einsum("od,ndt->not",
                        weight.astype(compute_dtype), inputs.astype(compute_dtype),
                        preferred_element_type=jnp.float32)
             + bias[None, :, None]).astype(inputs.dtype)

    # patches2features: 'b c p1 p2 (h w) -> b c (h p1) (w p2)'
    y = y.reshape(N, out_channel, P, P, h_scale, w_scale)   # b c p1 p2 h w
    y = jnp.transpose(y, (0, 1, 4, 2, 5, 3))                # b c h p1 w p2
    return y.reshape(N, out_channel, h_scale * P, w_scale * P)


def _reference(inputs, weight, bias, *, H, W, patch_size, out_channel):
    # Pure-JAX f32 reference (Conv1d k=1 == einsum) + same rearrange.
    y = jnp.einsum("ndt,od->not", inputs, weight) + bias[None, :, None]
    N = inputs.shape[0]
    P = patch_size
    h_scale, w_scale = H // P, W // P
    y = y.reshape(N, out_channel, P, P, h_scale, w_scale)
    y = jnp.transpose(y, (0, 1, 4, 2, 5, 3)).reshape(N, out_channel, H, W)
    return y


if __name__ == "__main__":
    # Small, shape-consistent config: H=W=16, P=4 -> patch_num=16, D=32, C=4, O=64.
    N, D = 2, 32
    H = W = 16
    P = 4
    C = 4
    patch_num = (H // P) * (W // P)
    O = C * P * P

    key = jax.random.PRNGKey(0)
    k1, k2, k3 = jax.random.split(key, 3)
    inputs = jax.random.normal(k1, (N, D, patch_num), dtype=jnp.float32)
    weight = jax.random.normal(k2, (O, D), dtype=jnp.float32) * 0.05  # Conv1d weight [O, D, 1] squeezed
    bias = jax.random.normal(k3, (O,), dtype=jnp.float32) * 0.05

    ref = _reference(inputs, weight, bias, H=H, W=W, patch_size=P, out_channel=C)

    # 1) f32 Pallas path: bit-tight correctness check against the f32 reference.
    out_f32 = decoder_forward(inputs, weight, bias, H=H, W=W, patch_size=P,
                              out_channel=C, compute_dtype=jnp.float32,
                              use_pallas=True)
    out_f32 = jax.block_until_ready(out_f32)
    assert out_f32.shape == (N, C, H, W)
    assert jnp.allclose(out_f32, ref, atol=1e-5, rtol=1e-5)

    # 2) bf16 operands (perf default on v5e/v6e/v7x): looser tolerance vs f32 ref.
    out_bf16 = decoder_forward(inputs, weight, bias, H=H, W=W, patch_size=P,
                               out_channel=C, compute_dtype=jnp.bfloat16,
                               use_pallas=True)
    out_bf16 = jax.block_until_ready(out_bf16)
    assert out_bf16.shape == (N, C, H, W)
    assert jnp.allclose(out_bf16, ref, atol=3e-2, rtol=3e-2)

    print("KERNEL_OK")
</pallas_src>

<mosaic_0001>
module attributes {stable_mosaic.version = 11 : i64} {
  func.func @_conv1x1_kernel(%arg0: i32, %arg1: i32, %arg2: memref<1x32x16xf32, #tpu.memory_space<vmem>>, %arg3: memref<64x32xf32, #tpu.memory_space<vmem>>, %arg4: memref<64x1xf32, #tpu.memory_space<vmem>>, %arg5: memref<1x64x16xf32, #tpu.memory_space<vmem>>) attributes {dimension_semantics = [#tpu.dimension_semantics<parallel>, #tpu.dimension_semantics<parallel>], iteration_bounds = array<i64: 2, 1>, scalar_prefetch = 0 : i64, scratch_operands = 0 : i64, tpu.core_type = #tpu.core_type<tc>, window_params = [{transform_indices = @transform_0, window_bounds = array<i64: 1, 32, 16>}, {pipeline_mode = #tpu.pipeline_mode<synchronous>, transform_indices = @transform_1, window_bounds = array<i64: 64, 32>}, {pipeline_mode = #tpu.pipeline_mode<synchronous>, transform_indices = @transform_2, window_bounds = array<i64: 64, 1>}, {transform_indices = @transform_3, window_bounds = array<i64: 1, 64, 16>}]} {
    %c0 = arith.constant 0 : index
    %c0_0 = arith.constant 0 : index
    %0 = vector.load %arg3[%c0, %c0_0] : memref<64x32xf32, #tpu.memory_space<vmem>>, vector<64x32xf32>
    %c0_1 = arith.constant 0 : index
    %c0_2 = arith.constant 0 : index
    %c0_3 = arith.constant 0 : index
    %1 = vector.load %arg2[%c0_1, %c0_2, %c0_3] : memref<1x32x16xf32, #tpu.memory_space<vmem>>, vector<1x32x16xf32>
    %2 = vector.shape_cast %1 : vector<1x32x16xf32> to vector<32x16xf32>
    %cst = arith.constant dense<0.000000e+00> : vector<64x16xf32>
    %3 = tpu.matmul %0, %2, %cst {dimension_numbers = #tpu.dot_dimension_numbers<[1], [0], [0], [1], [0, 0, 1, 1], [], []>} : vector<64x32xf32>, vector<32x16xf32>, vector<64x16xf32> -> vector<64x16xf32>
    %c0_4 = arith.constant 0 : index
    %c0_5 = arith.constant 0 : index
    %4 = vector.load %arg4[%c0_4, %c0_5] : memref<64x1xf32, #tpu.memory_space<vmem>>, vector<64x1xf32>
    %5 = vector.broadcast %4 : vector<64x1xf32> to vector<64x16xf32>
    %6 = arith.addf %3, %5 : vector<64x16xf32>
    %c0_6 = arith.constant 0 : index
    %c0_7 = arith.constant 0 : index
    %c0_8 = arith.constant 0 : index
    %7 = vector.load %arg5[%c0_6, %c0_7, %c0_8] : memref<1x64x16xf32, #tpu.memory_space<vmem>>, vector<1x64x16xf32>
    %8 = vector.shape_cast %7 : vector<1x64x16xf32> to vector<64x16xf32>
    %9 = vector.shape_cast %6 : vector<64x16xf32> to vector<1x64x16xf32>
    tpu.vector_store %arg5[%c0_6, %c0_7, %c0_8], %9 {strides = array<i32>} : memref<1x64x16xf32, #tpu.memory_space<vmem>>, vector<1x64x16xf32>,
    return
  }
  func.func @transform_0(%arg0: i32, %arg1: i32) -> (i32, i32, i32) {
    %c0_i32 = arith.constant 0 : i32
    %c0_i32_0 = arith.constant 0 : i32
    return %arg0, %c0_i32, %arg1 : i32, i32, i32
  }
  func.func @transform_1(%arg0: i32, %arg1: i32) -> (i32, i32) {
    %c0_i32 = arith.constant 0 : i32
    %c0_i32_0 = arith.constant 0 : i32
    %c0_i32_1 = arith.constant 0 : i32
    return %c0_i32, %c0_i32_0 : i32, i32
  }
  func.func @transform_2(%arg0: i32, %arg1: i32) -> (i32, i32) {
    %c0_i32 = arith.constant 0 : i32
    %c0_i32_0 = arith.constant 0 : i32
    %c0_i32_1 = arith.constant 0 : i32
    return %c0_i32, %c0_i32_0 : i32, i32
  }
  func.func @transform_3(%arg0: i32, %arg1: i32) -> (i32, i32, i32) {
    %c0_i32 = arith.constant 0 : i32
    %c0_i32_0 = arith.constant 0 : i32
    return %arg0, %c0_i32, %arg1 : i32, i32, i32
  }
}

</mosaic_0001>

<bundles_post_ra>
// kernel: tpu_custom_call.1
= control target key start
LH: loop header
LB: loop body
LE: loop exit
PB: predicated region body
PF: predicated region fallthrough
CT: control target
= control target key end

     0   :  { %s617_s12 = smov 0   ;;  %s619_s13 = smov 0   ;;  %s718_s0 = inlined_call_operand.vmem [shape: f32[2,32,16], index: 0, kind: input, shape index: {}]   ;;  %s719_s1 = inlined_call_operand.vmem [shape: f32[64,32], index: 1, kind: input, shape index: {}]   ;;  %s720_s2 = inlined_call_operand.vmem [shape: f32[64,1], index: 2, kind: input, shape index: {}]   ;;  %s721_s3 = inlined_call_operand.vmem [shape: f32[2,64,16], index: 3, kind: output, shape index: {}]  }
   0x1   :  { %s621_s14 = smov 0  }
   0x2 LB: > { %s25_s15 = sadd.s32 1, %s590_s13  ;;  %p488_p0 = scmp.ge.s32.totalorder %s594_s14, 1  ;;  %s594_s14 = sphi %s621_s14, %s13_s14   ;;  %s590_s13 = sphi %s619_s13, %s723_s13   ;;  %s586_s12 = sphi %s617_s12, %s722_s12  }
   0x3   : > { %p27_p1 = scmp.ge.s32.totalorder %s25_s15, 2  ;;  %p156_p2 = scmp.lt.s32.totalorder %s594_s14, 3 }
   0x5   : > { %s725_s15 = smov (%p27_p1, %s25_s15), 0  ;;  %p157_p3 = pnand %p488_p0, %p156_p2 }
   0x6   : > { %p186_p4 = scmp.lt.s32.totalorder (!%p157_p3), %s586_s12, 1 }
   0x7   : > { %160 = sbr.rel (%p157_p3) target bundleno = 226 (0xe2), region = 32 }
   0xc   : > { %v202_v0 = vld [vmem:[%s719_s1] sm:$0xff]  ;;  %vm262_vm0 = vcmask 261120   ;;  %s727_s12 = smov (!%p186_p4, %s586_s12), 1  ;;  %v596_v2 = vmov 0   ;;  %v216_v3 = vld [vmem:[%s720_s2 + $0x10] sm:$0xff]  ;;  %v203_v9 = vld [vmem:[%s719_s1 + $0x8] sm:$0xff] }
   0xd   : > { %v206_v1 = vld [vmem:[%s719_s1 + $0x20] sm:$0xff]  ;;  %525 = vmatprep.mubr.msk.f32.mxu0 %vm262_vm0, %v202_v0  ;;  %571 = vset.pattern.permute.xlu1 %v596_v2  ;;  %s503_s24 = sshll.u32 %s727_s12, 5  ;;  %v207_v10 = vld [vmem:[%s719_s1 + $0x28] sm:$0xff]  ;;  %v204_v11 = vld [vmem:[%s719_s1 + $0x10] sm:$0xff]  ;;  %s504_s29 = sshll.u32 %s727_s12, 6  ;;  %vm392_vm1 = vcmask 130048  }
   0xe   : > { %531 = vmatprep.mubr.msk.f32.mxu1 %vm262_vm0, %v206_v1  ;;  %570 = vset.pattern.permute.xlu0 %v596_v2  ;;  %v214_v4 = vld [vmem:[%s720_s2] sm:$0xff]  ;;  %s193_s27 = scalar_lea.vmem %s718_s0, %s503_s24  ;;  %v208_v12 = vld [vmem:[%s719_s1 + $0x30] sm:$0xff]  ;;  %v217_v13 = vld [vmem:[%s720_s2 + $0x18] sm:$0xff]  ;;  %s201_s5 = scalar_lea.vmem %s721_s3, %s504_s29 }
   0xf   : > { %234 = vperm.xlu1 %571, %v216_v3   ;;  %224 = vperm.xlu0 %570, %v214_v4   ;;  %v213_v5 = vld [vmem:[%s193_s27 + $0x18] sm:$0xff]  ;;  %v212_v6 = vld [vmem:[%s193_s27 + $0x10] sm:$0xff]  ;;  %v211_v7 = vld [vmem:[%s193_s27 + $0x8] sm:$0xff] }
  0x10   : > { %517 = vmatprep.subr.mxu0 %v213_v5  ;;  %537 = vmatprep.subr.mxu1 %v213_v5  ;;  %v210_v8 = vld [vmem:[%s193_s27] sm:$0xff]  ;;  %v215_v14 = vld [vmem:[%s720_s2 + $0x8] sm:$0xff]  ;;  %v205_v15 = vld [vmem:[%s719_s1 + $0x18] sm:$0xff] }
  0x11   : > { %518 = vmatpush3.msra.mxu0 %v213_v5  ;;  %541 = vmatpush3.msra.mxu1 %v213_v5  ;;  %v209_v16 = vld [vmem:[%s719_s1 + $0x38] sm:$0xff]  ;;  %v219_v17 = vld [vmem:[%s720_s2 + $0x28] sm:$0xff]  ;;  %v218_v18 = vld [vmem:[%s720_s2 + $0x20] sm:$0xff] }
  0x12   : > { %519 = vmatprep.subr.mxu0 %v212_v6  ;;  %538 = vmatprep.subr.mxu1 %v212_v6  ;;  %v221_v19 = vld [vmem:[%s720_s2 + $0x38] sm:$0xff]  ;;  %v220_v20 = vld [vmem:[%s720_s2 + $0x30] sm:$0xff] }
  0x13   : > { %520 = vmatpush3.msra.mxu0 %v212_v6  ;;  %542 = vmatpush3.msra.mxu1 %v212_v6 }
  0x14   : > { %521 = vmatprep.subr.mxu0 %v211_v7  ;;  %539 = vmatprep.subr.mxu1 %v211_v7 }
  0x15   : > { %522 = vmatpush3.msra.mxu0 %v211_v7  ;;  %543 = vmatpush3.msra.mxu1 %v211_v7 }
  0x16   : > { %523 = vmatprep.subr.mxu0 %v210_v8  ;;  %540 = vmatprep.subr.mxu1 %v210_v8 }
  0x17   : > { %524 = vmatpush3.msra.mxu0 %v210_v8  ;;  %544 = vmatpush3.msra.mxu1 %v210_v8 }
  0x18   : > { %526 = vmatmul.mubr.msk.f32.vlgmr.msra.gmra.mxu0 %vm262_vm0, %v203_v9  ;;  %532 = vmatmul.mubr.msk.f32.vlgmr.msra.gmra.mxu1 %vm262_vm0, %v207_v10 }
  0x19   : > { %528 = vmatprep.mubr.msk.f32.mxu0 %vm262_vm0, %v204_v11  ;;  %534 = vmatprep.mubr.msk.f32.mxu1 %vm262_vm0, %v208_v12 }
  0x1a   : > { %239 = vperm.xlu1 %571, %v217_v13   ;;  %229 = vperm.xlu0 %570, %v215_v14  }
  0x1c   : > { %529 = vmatmul.mubr.msk.f32.gmra.mxu0 %vm262_vm0, %v205_v15  ;;  %535 = vmatmul.mubr.msk.f32.gmra.mxu1 %vm262_vm0, %v209_v16 }
  0x1e   : > { %249 = vperm.xlu1 %571, %v219_v17   ;;  %244 = vperm.xlu0 %570, %v218_v18  }
  0x22   : > { %259 = vperm.xlu1 %571, %v221_v19   ;;  %254 = vperm.xlu0 %570, %v220_v20  }
  0x8a   : > { %v235_v21 = vpop.permute.xlu1 %234  ;;  %v225_v22 = vpop.permute.xlu0 %224 }
  0x95   : > { %v240_v23 = vpop.permute.xlu1 %239  ;;  %v230_v24 = vpop.permute.xlu0 %229 }
  0x99   : > { %v250_v25 = vpop.permute.xlu1 %249  ;;  %v245_v26 = vpop.permute.xlu0 %244 }
  0x9d   : > { %v260_v33 = vpop.permute.xlu1 %259  ;;  %v255_v38 = vpop.permute.xlu0 %254 }
  0xd8   : > { %v527_v27 = vpop.f32.mrf.mxu0  ;;  %v533_v28 = vpop.f32.mrf.mxu1 }
  0xd9   : > { %v359_v29 = vadd.f32 %v527_v27, %v230_v24  ;;  %v379_v30 = vadd.f32 %v533_v28, %v250_v25 }
  0xda   : > { %v353_v31 = vpop.f32.mrf.mxu0  ;;  %v373_v32 = vpop.f32.mrf.mxu1 }
  0xdb   : > { %394 = vst.msk [vmem:[%s201_s5 + $0x8] sm:$0xff] %vm392_vm1, %v359_v29  ;;  %398 = vst.msk [vmem:[%s201_s5 + $0x28] sm:$0xff] %vm392_vm1, %v379_v30  ;;  %v354_v34 = vadd.f32 %v353_v31, %v225_v22  ;;  %v374_v35 = vadd.f32 %v373_v32, %v245_v26 }
  0xdc   : > { %v530_v36 = vpop.f32.mrf.mxu0  ;;  %v536_v37 = vpop.f32.mrf.mxu1 }
  0xdd   : > { %393 = vst.msk [vmem:[%s201_s5] sm:$0xff] %vm392_vm1, %v354_v34  ;;  %397 = vst.msk [vmem:[%s201_s5 + $0x20] sm:$0xff] %vm392_vm1, %v374_v35  ;;  %v369_v39 = vadd.f32 %v530_v36, %v240_v23  ;;  %v389_v40 = vadd.f32 %v536_v37, %v260_v33 }
  0xde   : > { %v363_v41 = vpop.f32.mrf.mxu0  ;;  %v383_v42 = vpop.f32.mrf.mxu1 }
  0xdf   : > { %396 = vst.msk [vmem:[%s201_s5 + $0x18] sm:$0xff] %vm392_vm1, %v369_v39  ;;  %400 = vst.msk [vmem:[%s201_s5 + $0x38] sm:$0xff] %vm392_vm1, %v389_v40  ;;  %v364_v43 = vadd.f32 %v363_v41, %v235_v21  ;;  %v384_v44 = vadd.f32 %v383_v42, %v255_v38 }
  0xe1   : > { %395 = vst.msk [vmem:[%s201_s5 + $0x10] sm:$0xff] %vm392_vm1, %v364_v43  ;;  %399 = vst.msk [vmem:[%s201_s5 + $0x30] sm:$0xff] %vm392_vm1, %v384_v44 }
  0xe2 PF: > { %s13_s14 = sadd.s32 1, %s594_s14   ;;  %s722_s12 = smov %s590_s13 }
  0xe3   : > { %p10_p5 = scmp.ge.s32.totalorder %s13_s14, 4   ;;  %s723_s13 = smov %s725_s15 }
  0xe5   :  { %12 = sbr.rel (!%p10_p5) target bundleno = 2 (0x2), region = 62 }

</bundles_post_ra>
